<compile_context>
chip_gen: v6e
topology: v6e:2x2x1
jax: 0.10.0
libtpu: 0.0.40
codegen_flags: <defaults>
</compile_context>

<pallas_src>
import functools

import jax
import jax.numpy as jnp
from jax.experimental import pallas as pl
from jax.experimental.pallas import tpu as pltpu

LANES = 128
CHUNK_ROWS = 1024            # (1024,128) f32 = 512 KiB per elementwise temporary
MAX_BLOCK_ROWS = 8192        # (8192,128) f32 = 4 MiB per input buffer (x2 dbl-buffered)
TINY_ELEMS = 32 * 1024       # below ~128 KiB f32, plain jnp beats custom-call launch cost
VMEM_LIMIT_BYTES = 64 * 1024 * 1024   # explicit headroom (v5e default 16 MiB is tight)


def _round_up(a, b):
    return -(-a // b) * b


def _elem_loss(x, *, mode, target_is_real, for_disc, target_val):
    """Per-element term such that loss == mean(elem_loss(x)) over all elements.

    x is expected in float32; returns float32.
    """
    if mode == 'original':
        # binary_cross_entropy_with_logits against a constant target t:
        #   max(x, 0) - x*t + log(1 + exp(-|x|))
        # TODO(synk): on v6e/v7x, running exp/log1p in bf16 for bf16 inputs keeps the
        # EUP off the critical path; skipped to preserve exact agreement with the f32
        # reference (and it would hurt v5e, which has no bf16 EUP/VPU path).
        t = jnp.float32(target_val)
        return jnp.maximum(x, 0.0) - x * t + jnp.log1p(jnp.exp(-jnp.abs(x)))
    elif mode == 'ls':
        t = jnp.float32(target_val)
        d = x - t
        return d * d
    elif mode == 'hinge':
        if for_disc:
            if target_is_real:
                return jnp.maximum(1.0 - x, 0.0)   # == -min(x - 1, 0)
            return jnp.maximum(1.0 + x, 0.0)       # == -min(-x - 1, 0)
        return -x
    else:  # wgan-style fallback branch of GANLoss.loss
        return -x if target_is_real else x


def _partial_sum_kernel(x_ref, out_ref, *, mode, target_is_real, for_disc,
                        target_val, block_rows, chunk_rows, needs_mask, rem_last):
    """One grid step: elementwise loss over a (block_rows, 128) tile, folded to an
    (8, 128) per-block partial sum.  Compute is chunked into (chunk_rows, 128)
    slices so elementwise temporaries stay small regardless of the block size."""
    n_chunks = block_rows // chunk_rows          # static

    def accumulate(mask_tail):
        acc = jnp.zeros((8, LANES), jnp.float32)
        for c in range(n_chunks):                # static unrolled loop
            r0 = c * chunk_rows
            x = x_ref[pl.ds(r0, chunk_rows), :].astype(jnp.float32)
            vals = _elem_loss(x, mode=mode, target_is_real=target_is_real,
                              for_disc=for_disc, target_val=target_val)
            if mask_tail:
                # The last block can extend past the array's rows; Pallas leaves the
                # out-of-bounds region of the VMEM tile undefined, so
                # elem_loss(garbage) may be NaN/Inf.  jnp.where (select) does NOT
                # propagate NaN/Inf from the unselected operand -- do not replace
                # this select with a multiply-by-mask.
                row = jax.lax.broadcasted_iota(jnp.int32, vals.shape, 0) + r0
                col = jax.lax.broadcasted_iota(jnp.int32, vals.shape, 1)
                valid = (row * LANES + col) < rem_last   # <= 2^20, int32-safe
                vals = jnp.where(valid, vals, 0.0)
            # Layout-preserving (R,128)->(R/8,8,128) fold + vreg adds.
            acc = acc + vals.reshape(chunk_rows // 8, 8, LANES).sum(axis=0)
        return acc

    if needs_mask:
        i = pl.program_id(0)
        last = pl.num_programs(0) - 1

        @pl.when(i != last)
        def _():
            out_ref[...] = accumulate(False)

        @pl.when(i == last)
        def _():
            out_ref[...] = accumulate(True)
    else:
        out_ref[...] = accumulate(False)


def _pallas_body_sum(x2d, *, mode, target_is_real, for_disc, target_val):
    """Sum of elem_loss over a lane-dense (rows, 128) slab via a streaming Pallas reduce."""
    rows = x2d.shape[0]
    if rows <= 2 * CHUNK_ROWS:
        # Small/medium: ~2 blocks (lets v7x split across both TCs), any-dtype tiling.
        block_rows = _round_up(-(-rows // 2), 32)
        chunk_rows = block_rows
    else:
        block_rows = min(MAX_BLOCK_ROWS, _round_up(-(-rows // 2), CHUNK_ROWS))
        chunk_rows = CHUNK_ROWS
    num_blocks = -(-rows // block_rows)                  # always >= 2 here
    needs_mask = num_blocks * block_rows != rows
    rem_last = (rows - (num_blocks - 1) * block_rows) * LANES  # valid elems in last block

    kernel = functools.partial(
        _partial_sum_kernel, mode=mode, target_is_real=target_is_real,
        for_disc=for_disc, target_val=target_val, block_rows=block_rows,
        chunk_rows=chunk_rows, needs_mask=needs_mask, rem_last=rem_last)

    body_elems = rows * LANES
    cost = pl.CostEstimate(
        flops=(8 if mode == 'original' else 3) * body_elems,
        transcendentals=(2 * body_elems) if mode == 'original' else 0,
        bytes_accessed=body_elems * x2d.dtype.itemsize + num_blocks * 8 * LANES * 4)

    partials = pl.pallas_call(
        kernel,
        out_shape=jax.ShapeDtypeStruct((num_blocks * 8, LANES), jnp.float32),
        grid=(num_blocks,),
        in_specs=[pl.BlockSpec((block_rows, LANES), lambda i: (i, 0))],
        out_specs=pl.BlockSpec((8, LANES), lambda i: (i, 0)),
        compiler_params=pltpu.CompilerParams(
            dimension_semantics=("parallel",),       # v7x: split stream across 2 TCs
            vmem_limit_bytes=VMEM_LIMIT_BYTES),
        cost_estimate=cost,
    )(x2d)
    # Tiny final cross-lane reduce outside the kernel.
    return jnp.sum(partials)


def _pallas_mean_loss(x, *, mode, target_is_real, for_disc, target_val):
    """Full mean of elem_loss(x) over all elements."""
    n = int(x.size)
    kw = dict(mode=mode, target_is_real=target_is_real, for_disc=for_disc,
              target_val=target_val)

    if n < TINY_ELEMS:
        # Tiny inputs: XLA's fused elementwise+reduce is already at roofline; the
        # pallas custom-call launch + pipeline prologue would dominate.
        return jnp.mean(_elem_loss(x.astype(jnp.float32), **kw))

    flat = jnp.ravel(x)                     # free (bitcast) for contiguous inputs; keep dtype
    n_body = (n // LANES) * LANES

    if n_body == n:
        # Common case: numel % 128 == 0 -> zero-copy lane-dense view.
        total = _pallas_body_sum(flat.reshape(n // LANES, LANES), **kw)
    else:
        # Ragged case: Pallas streams the 128-aligned body, the <128-element tail is
        # reduced in plain jnp.  NOTE: XLA may materialize the prefix slice for the
        # custom call; still cheaper than the previous full pad copy (no zero write +
        # re-read) and it disappears entirely for 128-aligned sizes.
        body = flat[:n_body].reshape(n_body // LANES, LANES)
        total = _pallas_body_sum(body, **kw)
        total = total + jnp.sum(_elem_loss(flat[n_body:].astype(jnp.float32), **kw))

    return total / jnp.float32(n)


class GANLoss:
    """JAX/Pallas port of networks/loss.py::GANLoss (no trainable params)."""

    def __init__(self, gan_mode='hinge', target_real_label=1.0,
                 target_fake_label=0.0, tensor=None, opt=None):
        self.gan_mode = gan_mode
        self.real_label = float(target_real_label)
        self.fake_label = float(target_fake_label)

    def loss(self, input, target_is_real, for_disc=True):
        target_val = self.real_label if target_is_real else self.fake_label
        return _pallas_mean_loss(
            input, mode=self.gan_mode, target_is_real=bool(target_is_real),
            for_disc=bool(for_disc), target_val=target_val)

    def __call__(self, input, target_is_real, for_disc=True):
        if isinstance(input, (list, tuple)):
            # Multiscale discriminator path.  Each self.loss(...) is a scalar, so
            # torch's view(bs,-1).mean(dim=1) gives a shape-(1,) tensor and
            # `loss / len(loss)` divides by 1 -> the SUM of per-scale losses
            # (intentionally reproduced torch quirk).
            # TODO(synk): fuse the per-scale predictions into a single pallas_call
            # (per-scale partial sums + counts via PrefetchScalarGridSpec offsets)
            # to amortize launch cost; small heads currently take the jnp bypass.
            total = jnp.zeros((1,), jnp.float32)
            for pred_i in input:
                if isinstance(pred_i, (list, tuple)):
                    pred_i = pred_i[-1]
                loss_tensor = self.loss(pred_i, target_is_real, for_disc)
                total = total + jnp.reshape(loss_tensor, (1,))
            return total / total.shape[0]
        return self.loss(input, target_is_real, for_disc)


# ---------------------------- pure-JAX reference ----------------------------
def _ref_loss(x, mode, target_is_real, for_disc, real_label=1.0, fake_label=0.0):
    x = x.astype(jnp.float32)
    if mode == 'original':
        t = real_label if target_is_real else fake_label
        return jnp.mean(jnp.maximum(x, 0.0) - x * t + jnp.log1p(jnp.exp(-jnp.abs(x))))
    if mode == 'ls':
        t = real_label if target_is_real else fake_label
        return jnp.mean((x - t) ** 2)
    if mode == 'hinge':
        if for_disc:
            if target_is_real:
                return -jnp.mean(jnp.minimum(x - 1.0, 0.0))
            return -jnp.mean(jnp.minimum(-x - 1.0, 0.0))
        return -jnp.mean(x)
    return -jnp.mean(x) if target_is_real else jnp.mean(x)


if __name__ == "__main__":
    key = jax.random.PRNGKey(0)
    k1, k2, k3, k4, k5, k6 = jax.random.split(key, 6)

    # Discriminator logits, NCHW (PyTorch convention).
    x = jax.random.normal(k1, (2, 4, 16, 16), dtype=jnp.float32)        # 2048 elems -> jnp bypass
    x_small = jax.random.normal(k2, (2, 1, 8, 8), dtype=jnp.float32)    # 128 elems  -> jnp bypass
    x_odd = jax.random.normal(k3, (1, 1, 31, 17), dtype=jnp.float32)    # 527 elems  -> jnp bypass
    x_align = jax.random.normal(k4, (1, 4, 128, 128), dtype=jnp.float32)  # 65536 -> pallas, 2 blocks, no mask
    x_rag = jax.random.normal(k5, (1, 4, 100, 129), dtype=jnp.float32)  # 51600 -> pallas body + jnp tail + mask
    x_big = jax.random.normal(k6, (1, 8, 320, 257), dtype=jnp.float32)  # 657920 -> multi-chunk blocks + mask
    x_big_bf16 = x_big.astype(jnp.bfloat16)                             # in-kernel bf16->f32 cast path

    ok = True
    for mode in ('hinge', 'original', 'ls', 'w'):
        crit = GANLoss(gan_mode=mode)
        for target_is_real in (True, False):
            for for_disc in (True, False):
                for inp in (x, x_small, x_odd, x_align, x_rag, x_big, x_big_bf16):
                    got = jax.block_until_ready(crit(inp, target_is_real, for_disc))
                    want = _ref_loss(inp, mode, target_is_real, for_disc)
                    ok &= bool(jnp.allclose(got, want, atol=3e-5, rtol=3e-5))

    # Multiscale-discriminator style list input (list of [features..., pred]).
    crit = GANLoss(gan_mode='hinge')
    multi = [[x, x_big], x_small]
    got_list = jax.block_until_ready(crit(multi, True, True))
    # torch's `loss / len(loss)` divides by 1 (loss has shape (1,)) -> sum of scales.
    want_list = (_ref_loss(x_big, 'hinge', True, True) +
                 _ref_loss(x_small, 'hinge', True, True))
    ok &= got_list.shape == (1,)
    ok &= bool(jnp.allclose(got_list[0], want_list, atol=3e-5, rtol=3e-5))

    if ok:
        print("KERNEL_OK")
    else:
        raise SystemExit("mismatch vs reference")
</pallas_src>

<mosaic_0001>
module attributes {stable_mosaic.version = 11 : i64} {
  func.func @_partial_sum_kernel(%arg0: i32, %arg1: memref<256x128xf32, #tpu.memory_space<vmem>>, %arg2: memref<8x128xf32, #tpu.memory_space<vmem>>) attributes {dimension_semantics = [#tpu.dimension_semantics<parallel>], iteration_bounds = array<i64: 2>, scalar_prefetch = 0 : i64, scratch_operands = 0 : i64, tpu.core_type = #tpu.core_type<tc>, window_params = [{transform_indices = @transform_0, window_bounds = array<i64: 256, 128>}, {transform_indices = @transform_1, window_bounds = array<i64: 8, 128>}]} {
    %cst = arith.constant 0.000000e+00 : f32
    %0 = vector.broadcast %cst : f32 to vector<8x128xf32>
    %c0 = arith.constant 0 : index
    %c0_0 = arith.constant 0 : index
    %1 = vector.load %arg1[%c0, %c0_0] : memref<256x128xf32, #tpu.memory_space<vmem>>, vector<256x128xf32>
    %cst_1 = arith.constant 1.000000e+00 : f32
    %2 = vector.broadcast %cst_1 : f32 to vector<256x128xf32>
    %3 = arith.subf %2, %1 : vector<256x128xf32>
    %cst_2 = arith.constant 0.000000e+00 : f32
    %4 = vector.broadcast %cst_2 : f32 to vector<256x128xf32>
    %5 = arith.maximumf %3, %4 : vector<256x128xf32>
    %6 = vector.shape_cast %5 : vector<256x128xf32> to vector<32x8x128xf32>
    %cst_3 = arith.constant dense<0.000000e+00> : vector<8x128xf32>
    %7 = vector.multi_reduction <add>, %6, %cst_3 [0] : vector<32x8x128xf32> to vector<8x128xf32>
    %8 = arith.addf %0, %7 : vector<8x128xf32>
    %c0_4 = arith.constant 0 : index
    %c0_5 = arith.constant 0 : index
    %9 = vector.load %arg2[%c0_4, %c0_5] : memref<8x128xf32, #tpu.memory_space<vmem>>, vector<8x128xf32>
    tpu.vector_store %arg2[%c0_4, %c0_5], %8 {strides = array<i32>} : memref<8x128xf32, #tpu.memory_space<vmem>>, vector<8x128xf32>,
    return
  }
  func.func @transform_0(%arg0: i32) -> (i32, i32) {
    %c0_i32 = arith.constant 0 : i32
    %c0_i32_0 = arith.constant 0 : i32
    return %arg0, %c0_i32 : i32, i32
  }
  func.func @transform_1(%arg0: i32) -> (i32, i32) {
    %c0_i32 = arith.constant 0 : i32
    %c0_i32_0 = arith.constant 0 : i32
    return %arg0, %c0_i32 : i32, i32
  }
}

</mosaic_0001>

<bundles_post_ra>
// kernel: tpu_custom_call.1
= control target key start
LH: loop header
LB: loop body
LE: loop exit
PB: predicated region body
PF: predicated region fallthrough
CT: control target
= control target key end

     0   :  { %6 = vsyncpa [#allocation3], 0  ;;  %s694_s0 = inlined_call_operand.hbm [shape: f32[512,128], index: 0, kind: input, shape index: {}]   ;;  %s695_s1 = inlined_call_operand.hbm [shape: f32[16,128], index: 1, kind: output, shape index: {}]  }
   0x1   :  { %8 = vsyncpa [#allocation3 + $0x1], 0 }
   0x2   :  { %9 = vsyncpa [#allocation4], 0 }
   0x3   :  { %11 = vsyncpa [#allocation4 + $0x1], 0  ;;  %s519_s6 = smov 0   ;;  %s521_s7 = smov 0  }
   0x4   :  { %s523_s8 = smov 0   ;;  %s525_s9 = smov 0  }
   0x5 LB: > { %s540_s10 = sadd.s32 4294967295, %s503_s9   ;;  %s349_s11 = sadd.s32 4294967294, %s503_s9   ;;  %s503_s9 = sphi %s525_s9, %s710_s9   ;;  %s499_s8 = sphi %s523_s8, %s709_s8   ;;  %s495_s7 = sphi %s521_s7, %s708_s7   ;;  %s491_s6 = sphi %s519_s6, %s707_s6  }
   0x6   : > { %s544_s12 = sadd.s32 1, %s503_s9   ;;  %s24_s13 = sadd.s32 1, %s499_s8 }
   0x7   : > { %s21_s14 = ssub.s32 %s503_s9, %s544_s12  ;;  %p31_p0 = scmp.ne.s32.totalorder %s499_s8, %s495_s7 }
   0x8   : > { %p22_p1 = scmp.eq.s32.totalorder %s21_s14, 0  ;;  %p32_p2 = scmp.eq.s32.totalorder %s503_s9, 0 }
   0x9   : > { %p37_p3 = scmp.ne.s32.totalorder %s495_s7, %s491_s6  ;;  %p38_p4 = scmp.eq.s32.totalorder %s540_s10, 0 }
   0xa   : > { %s556_s15 = scalar_select %p22_p1, %s499_s8, %s24_s13  }
   0xb   : > { %p558_p5 = por %p32_p2, %p31_p0  ;;  %p562_p6 = por %p38_p4, %p37_p3 }
   0xc   : > { %p61_p7 = scmp.eq.s32.totalorder %s540_s10, 1  ;;  %p67_p8 = scmp.eq.s32.totalorder %s349_s11, 1 }
   0xd   : > { %s699_s17 = scalar_select %p562_p6, 1, 0 }
   0xe   : > { %p375_p10 = scmp.lt.s32.totalorder %s503_s9, 2  ;;  %p569_p11 = por %p61_p7, %p31_p0 }
   0xf   : > { %p573_p12 = por %p67_p8, %p37_p3  ;;  %s87_s20 = sand.u32 1, %s499_s8  }
  0x10   : > { %s700_s18 = scalar_select %p569_p11, 1, 0 }
  0x11   : > { %s701_s19 = scalar_select %p573_p12, 1, 0 }
  0x12   : > { %s362_s21 = sshll.u32 %s503_s9, 12  ;;  %s352_s22 = sshll.u32 %s87_s20, 8 }
  0x13   : > { %s582_s25 = scalar_lea.hbm %s694_s0, %s362_s21  ;;  %s91_s26 = scalar_lea.vmem [#allocation2], %s352_s22 }
  0x14   : > { %s98_s27 = sshll.u32 %s91_s26, 4  ;;  %p586_p13 = pnand %p375_p10, %p558_p5  ;;  %s590_s27 = int_to_ptr.vmem [resolvable:$true] %s98_s27 }
  0x15   : > { %s592_s29 = scalar_lea.sflag [#allocation3], %s87_s20  ;;  %s411_s30 = scalar_lea.hbm %s582_s25, 4096 }
  0x16   : > { %p412_p0 = scmp.ne.s32.totalorder %s582_s25, %s411_s30  ;;  %p413_p1 = pneg %p586_p13 }
  0x17   : > { %s416_s4 = scalar_lea.hbm %s694_s0, 8192  ;;  %p417_p4 = scmp.lt.s32.totalorder %s582_s25, %s694_s0 }
  0x18   : > { %p414_p2 = pnand %p413_p1, %p412_p0  ;;  %p418_p5 = scmp.lt.s32.totalorder %s416_s4, %s411_s30 }
  0x1a   : > { %p415_p3 = pneg %p414_p2  ;;  %p419_p7 = por %p418_p5, %p417_p4 }
  0x1c   : > { %p420_p8 = pnand %p419_p7, %p415_p3 }
  0x1e   : > { %423 = shalt.err (!%p420_p8)
}
  0x1f   : > { %s424_s13 = scalar_lea.vmem %s590_s27, 4096  ;;  %s505_s14 = smov [#allocation2]  }
  0x20   : > { %p425_p10 = scmp.ne.s32.totalorder %s590_s27, %s424_s13  ;;  %s429_s16 = sshll.u32 %s505_s14, 4  ;;  %s430_s16 = int_to_ptr.vmem [resolvable:$false] %s429_s16 }
  0x21   : > { %s431_s20 = scalar_lea.vmem %s430_s16, 8192  ;;  %p432_p2 = scmp.lt.s32.totalorder %s590_s27, %s430_s16 }
  0x22   : > { %p427_p9 = pnand %p425_p10, %p413_p1  ;;  %p433_p12 = scmp.lt.s32.totalorder %s431_s20, %s424_s13 }
  0x24   : > { %p428_p0 = pneg %p427_p9  ;;  %p434_p11 = por %p433_p12, %p432_p2 }
  0x26   : > { %p435_p6 = pnand %p434_p11, %p428_p0 }
  0x28   : > { %438 = shalt.err (!%p435_p6)
}
  0x29   : > { %s506_s21 = smov 128   ;;  %s507_s22 = smov 8  }
  0x2a   : > { %370 = dma.hbm_to_vmem [thread:$0]  (!%p586_p13), %s582_s25, 4096, %s590_s27, %s592_s29, %s506_s21, %s506_s21, %s507_s22  }
  0x2b   : > { %p355_p9 = scmp.ge.s32.totalorder %s503_s9, 1  ;;  %p106_p1 = scmp.lt.s32.totalorder %s503_s9, 3 }
  0x2d   : > { %p107_p3 = pnand %p355_p9, %p106_p1 }
  0x2e   : > { %s616_s23 = sand.u32 (!%p107_p3), 1, %s495_s7   ;;  %p703_p6 = scmp.ne.s32.totalorder (!%p107_p3), %s699_s17, 0 }
  0x2f   : > { %110 = sbr.rel (%p107_p3) target bundleno = 133 (0x85), region = 24  ;;  %s356_s24 = sshll.u32 (!%p107_p3), %s616_s23, 8 }
  0x30   : > { %s113_s26 = scalar_lea.sflag (!%p107_p3), [#allocation3], %s616_s23  ;;  %s620_s30 = scalar_lea.vmem (!%p107_p3), [#allocation2], %s356_s24 }
  0x34   : > { %482 = dma.done.wait (%p703_p6), %s113_s26, 4096  }
  0x35   : > { %484 = vsyncadd (%p703_p6), %s113_s26, 4294963200  ;;  %v136_v0 = vld [vmem:[%s620_s30] sm:$0xff]  ;;  %v137_v1 = vld [vmem:[%s620_s30 + $0x8] sm:$0xff]  ;;  %s357_s17 = sshll.u32 %s616_s23, 3  ;;  %s359_s28 = sshll.u32 %s540_s10, 7 }
  0x36   : > { %v138_v2 = vld [vmem:[%s620_s30 + $0x10] sm:$0xff]  ;;  %v168_v3 = vsub.f32 1.0, %v136_v0  ;;  %v169_v4 = vsub.f32 1.0, %v137_v1  ;;  %v139_v5 = vld [vmem:[%s620_s30 + $0x18] sm:$0xff]  ;;  %v140_v7 = vld [vmem:[%s620_s30 + $0x20] sm:$0xff]  ;;  %s134_s25 = scalar_lea.vmem [#allocation5], %s357_s17  ;;  %s277_s3 = scalar_lea.hbm %s695_s1, %s359_s28 }
  0x37   : > { %v170_v6 = vsub.f32 1.0, %v138_v2  ;;  %v171_v8 = vsub.f32 1.0, %v139_v5  ;;  %v141_v11 = vld [vmem:[%s620_s30 + $0x28] sm:$0xff]  ;;  %v172_v12 = vsub.f32 1.0, %v140_v7  ;;  %v142_v14 = vld [vmem:[%s620_s30 + $0x30] sm:$0xff]  ;;  %v143_v18 = vld [vmem:[%s620_s30 + $0x38] sm:$0xff] }
  0x38   : > { %v200_v9 = vmax.f32 %v168_v3, 0.0  ;;  %v201_v10 = vmax.f32 %v169_v4, 0.0  ;;  %v173_v15 = vsub.f32 1.0, %v141_v11  ;;  %v174_v19 = vsub.f32 1.0, %v142_v14  ;;  %v144_v22 = vld [vmem:[%s620_s30 + $0x40] sm:$0xff]  ;;  %v145_v26 = vld [vmem:[%s620_s30 + $0x48] sm:$0xff] }
  0x39   : > { %v202_v13 = vmax.f32 %v170_v6, 0.0  ;;  %v203_v16 = vmax.f32 %v171_v8, 0.0  ;;  %v204_v20 = vmax.f32 %v172_v12, 0.0  ;;  %v175_v23 = vsub.f32 1.0, %v143_v18  ;;  %v146_v30 = vld [vmem:[%s620_s30 + $0x50] sm:$0xff]  ;;  %v147_v34 = vld [vmem:[%s620_s30 + $0x58] sm:$0xff] }
  0x3a   : > { %v232_v17 = vadd.f32 %v201_v10, %v200_v9  ;;  %v205_v24 = vmax.f32 %v173_v15, 0.0  ;;  %v176_v27 = vsub.f32 1.0, %v144_v22  ;;  %v206_v28 = vmax.f32 %v174_v19, 0.0  ;;  %v148_v38 = vld [vmem:[%s620_s30 + $0x60] sm:$0xff]  ;;  %v149_v42 = vld [vmem:[%s620_s30 + $0x68] sm:$0xff]  ;;  %v150_v46 = vld [vmem:[%s620_s30 + $0x70] sm:$0xff] }
  0x3b   : > { %v177_v31 = vsub.f32 1.0, %v145_v26  ;;  %v207_v32 = vmax.f32 %v175_v23, 0.0  ;;  %v178_v35 = vsub.f32 1.0, %v146_v30  ;;  %v179_v39 = vsub.f32 1.0, %v147_v34  ;;  %v151_v50 = vld [vmem:[%s620_s30 + $0x78] sm:$0xff]  ;;  %v152_v54 = vld [vmem:[%s620_s30 + $0x80] sm:$0xff] }
  0x3c   : > { %v233_v21 = vadd.f32 %v232_v17, %v202_v13  ;;  %v208_v36 = vmax.f32 %v176_v27, 0.0  ;;  %v180_v43 = vsub.f32 1.0, %v148_v38  ;;  %v181_v47 = vsub.f32 1.0, %v149_v42  ;;  %v153_v58 = vld [vmem:[%s620_s30 + $0x88] sm:$0xff]  ;;  %v154_v62 = vld [vmem:[%s620_s30 + $0x90] sm:$0xff]  ;;  %v155_v2 = vld [vmem:[%s620_s30 + $0x98] sm:$0xff] }
  0x3d   : > { %v209_v40 = vmax.f32 %v177_v31, 0.0  ;;  %v210_v44 = vmax.f32 %v178_v35, 0.0  ;;  %v211_v48 = vmax.f32 %v179_v39, 0.0  ;;  %v182_v51 = vsub.f32 1.0, %v150_v46  ;;  %v156_v6 = vld [vmem:[%s620_s30 + $0xa0] sm:$0xff]  ;;  %v157_v10 = vld [vmem:[%s620_s30 + $0xa8] sm:$0xff] }
  0x3e   : > { %v234_v25 = vadd.f32 %v233_v21, %v203_v16  ;;  %v212_v52 = vmax.f32 %v180_v43, 0.0  ;;  %v183_v55 = vsub.f32 1.0, %v151_v50  ;;  %v213_v56 = vmax.f32 %v181_v47, 0.0  ;;  %v158_v14 = vld [vmem:[%s620_s30 + $0xb0] sm:$0xff]  ;;  %v159_v18 = vld [vmem:[%s620_s30 + $0xb8] sm:$0xff]  ;;  %v160_v22 = vld [vmem:[%s620_s30 + $0xc0] sm:$0xff] }
  0x3f   : > { %v184_v59 = vsub.f32 1.0, %v152_v54  ;;  %v214_v60 = vmax.f32 %v182_v51, 0.0  ;;  %v185_v63 = vsub.f32 1.0, %v153_v58  ;;  %v186_v3 = vsub.f32 1.0, %v154_v62  ;;  %v161_v26 = vld [vmem:[%s620_s30 + $0xc8] sm:$0xff]  ;;  %v162_v30 = vld [vmem:[%s620_s30 + $0xd0] sm:$0xff] }
  0x40   : > { %v235_v29 = vadd.f32 %v234_v25, %v204_v20  ;;  %v215_v0 = vmax.f32 %v183_v55, 0.0  ;;  %v187_v7 = vsub.f32 1.0, %v155_v2  ;;  %v188_v11 = vsub.f32 1.0, %v156_v6  ;;  %v163_v34 = vld [vmem:[%s620_s30 + $0xd8] sm:$0xff]  ;;  %v164_v38 = vld [vmem:[%s620_s30 + $0xe0] sm:$0xff]  ;;  %v165_v42 = vld [vmem:[%s620_s30 + $0xe8] sm:$0xff] }
  0x41   : > { %v216_v4 = vmax.f32 %v184_v59, 0.0  ;;  %v217_v8 = vmax.f32 %v185_v63, 0.0  ;;  %v218_v12 = vmax.f32 %v186_v3, 0.0  ;;  %v189_v15 = vsub.f32 1.0, %v157_v10  ;;  %v166_v46 = vld [vmem:[%s620_s30 + $0xf0] sm:$0xff]  ;;  %v167_v50 = vld [vmem:[%s620_s30 + $0xf8] sm:$0xff] }
  0x42   : > { %v236_v33 = vadd.f32 %v235_v29, %v205_v24  ;;  %v219_v16 = vmax.f32 %v187_v7, 0.0  ;;  %v190_v19 = vsub.f32 1.0, %v158_v14  ;;  %v220_v20 = vmax.f32 %v188_v11, 0.0  ;;  %s279_s27 = sshll.u32 %s134_s25, 4  ;;  %s266_s4 = scalar_lea.sflag [#allocation4], %s616_s23  ;;  %s280_s27 = int_to_ptr.vmem [resolvable:$true] %s279_s27 }
  0x43   : > { %v191_v23 = vsub.f32 1.0, %v159_v18  ;;  %v221_v24 = vmax.f32 %v189_v15, 0.0  ;;  %v192_v27 = vsub.f32 1.0, %v160_v22  ;;  %v193_v31 = vsub.f32 1.0, %v161_v26  ;;  %s439_s5 = scalar_lea.vmem %s280_s27, 128  ;;  %p704_p12 = scmp.ne.s32.totalorder %s700_s18, 0 }
  0x44   : > { %v237_v37 = vadd.f32 %v236_v33, %v206_v28  ;;  %v222_v28 = vmax.f32 %v190_v19, 0.0  ;;  %v194_v35 = vsub.f32 1.0, %v162_v30  ;;  %v195_v39 = vsub.f32 1.0, %v163_v34  ;;  %p440_p11 = scmp.ne.s32.totalorder %s280_s27, %s439_s5  ;;  %s508_s11 = smov [#allocation5]  }
  0x45   : > { %v196_v43 = vsub.f32 1.0, %v164_v38  ;;  %v197_v47 = vsub.f32 1.0, %v165_v42  ;;  %v198_v51 = vsub.f32 1.0, %v166_v46  ;;  %v199_v54 = vsub.f32 1.0, %v167_v50  ;;  %s443_s13 = sshll.u32 %s508_s11, 4  ;;  %s444_s13 = int_to_ptr.vmem [resolvable:$false] %s443_s13 }
  0x46   : > { %v238_v41 = vadd.f32 %v237_v37, %v207_v32  ;;  %v223_v32 = vmax.f32 %v191_v23, 0.0  ;;  %p441_p13 = pnand %p440_p11, %p704_p12  ;;  %s445_s14 = scalar_lea.vmem %s444_s13, 256 }
  0x47   : > { %v229_v55 = vmax.f32 %v197_v47, 0.0  ;;  %v231_v59 = vmax.f32 %v199_v54, 0.0  ;;  %p446_p5 = scmp.lt.s32.totalorder %s280_s27, %s444_s13  ;;  %p447_p7 = scmp.lt.s32.totalorder %s445_s14, %s439_s5 }
  0x48   : > { %v239_v45 = vadd.f32 %v238_v41, %v208_v36  ;;  %v224_v36 = vmax.f32 %v192_v27, 0.0  ;;  %p442_p4 = pneg %p441_p13 }
  0x49   : > { %p448_p8 = por %p447_p7, %p446_p5 }
  0x4a   : > { %v240_v49 = vadd.f32 %v239_v45, %v209_v40  ;;  %v225_v40 = vmax.f32 %v193_v31, 0.0 }
  0x4b   : > { %p449_p10 = pnand %p448_p8, %p442_p4 }
  0x4c   : > { %v241_v53 = vadd.f32 %v240_v49, %v210_v44  ;;  %v226_v44 = vmax.f32 %v194_v35, 0.0 }
  0x4e   : > { %v242_v57 = vadd.f32 %v241_v53, %v211_v48  ;;  %v227_v48 = vmax.f32 %v195_v39, 0.0 }
  0x50   : > { %v243_v61 = vadd.f32 %v242_v57, %v212_v52  ;;  %v228_v52 = vmax.f32 %v196_v43, 0.0  ;;  %v230_v57 = vmax.f32 %v198_v51, 0.0 }
  0x52   : > { %v244_v1 = vadd.f32 %v243_v61, %v213_v56 }
  0x54   : > { %v245_v5 = vadd.f32 %v244_v1, %v214_v60 }
  0x56   : > { %v246_v9 = vadd.f32 %v245_v5, %v215_v0 }
  0x58   : > { %v247_v13 = vadd.f32 %v246_v9, %v216_v4 }
  0x5a   : > { %v248_v17 = vadd.f32 %v247_v13, %v217_v8 }
  0x5c   : > { %v249_v21 = vadd.f32 %v248_v17, %v218_v12 }
  0x5e   : > { %v250_v25 = vadd.f32 %v249_v21, %v219_v16 }
  0x60   : > { %v251_v29 = vadd.f32 %v250_v25, %v220_v20 }
  0x62   : > { %v252_v33 = vadd.f32 %v251_v29, %v221_v24 }
  0x64   : > { %v253_v37 = vadd.f32 %v252_v33, %v222_v28 }
  0x66   : > { %v254_v41 = vadd.f32 %v253_v37, %v223_v32 }
  0x68   : > { %v255_v45 = vadd.f32 %v254_v41, %v224_v36 }
  0x6a   : > { %v256_v49 = vadd.f32 %v255_v45, %v225_v40 }
  0x6c   : > { %v257_v53 = vadd.f32 %v256_v49, %v226_v44 }
  0x6e   : > { %v258_v56 = vadd.f32 %v257_v53, %v227_v48 }
  0x70   : > { %v259_v58 = vadd.f32 %v258_v56, %v228_v52 }
  0x72   : > { %v260_v60 = vadd.f32 %v259_v58, %v229_v55 }
  0x74   : > { %v261_v61 = vadd.f32 %v260_v60, %v230_v57 }
  0x76   : > { %v262_v62 = vadd.f32 %v261_v61, %v231_v59 }
  0x78   : > { %264 = vst [vmem:[%s134_s25] sm:$0xff] %v262_v62 }
  0x79   : > { %452 = shalt.err (!%p449_p10)
}
  0x7a   : > { %s453_s10 = scalar_lea.hbm %s277_s3, 128  ;;  %s457_s21 = scalar_lea.hbm %s695_s1, 256 }
  0x7b   : > { %p454_p0 = scmp.ne.s32.totalorder %s277_s3, %s453_s10  ;;  %p458_p1 = scmp.lt.s32.totalorder %s277_s3, %s695_s1 }
  0x7c   : > { %p459_p3 = scmp.lt.s32.totalorder %s457_s21, %s453_s10 }
  0x7d   : > { %p455_p2 = pnand %p454_p0, %p704_p12 }
  0x7e   : > { %p460_p6 = por %p459_p3, %p458_p1 }
  0x7f   : > { %p456_p9 = pneg %p455_p2 }
  0x81   : > { %p461_p11 = pnand %p460_p6, %p456_p9 }
  0x83   : > { %464 = shalt.err (!%p461_p11)
}
  0x84   : > { %365 = dma.vmem_to_hbm [thread:$0]  (%p704_p12), %s280_s27, 128, %s277_s3, %s266_s4  }
  0x85 PF: > { %s291_s24 = sand.u32 1, %s491_s6   ;;  %p705_p13 = scmp.ne.s32.totalorder %s701_s19, 0 }
  0x86   : > { %p706_p4 = scmp.ge.s32.totalorder %s503_s9, 2  ;;  %s292_s26 = scalar_lea.sflag [#allocation4], %s291_s24 }
  0x88   : > { %p372_p5 = pnand %p706_p4, %p705_p13 }
  0x8a   : > { %p373_p7 = pneg %p372_p5 }
  0x8c   : > { %486 = dma.done.wait (%p373_p7), %s292_s26, 128  }
  0x8d   : > { %488 = vsyncadd (%p373_p7), %s292_s26, 4294967168  ;;  %p14_p8 = scmp.ge.s32.totalorder %s544_s12, 4   ;;  %s707_s6 = smov %s495_s7 }
  0x8e   : > { %s708_s7 = smov %s499_s8  ;;  %s709_s8 = smov %s556_s15 }
  0x8f   : > { %s710_s9 = smov %s544_s12  ;;  %16 = sbr.rel (!%p14_p8) target bundleno = 5 (0x5), region = 69 }
  0x94   :  { %297 = vsyncpa [#allocation3], 1 }
  0x95   :  { %299 = vsyncpa [#allocation3 + $0x1], 1 }
  0x96   :  { %300 = vsyncpa [#allocation4], 1 }
  0x97   :  { %302 = vsyncpa [#allocation4 + $0x1], 1 }

</bundles_post_ra>
